<compile_context>
chip_gen: v7x
topology: tpu7x:2x2x1
jax: 0.10.0
libtpu: 0.0.40
codegen_flags: <defaults>
</compile_context>

<pallas_src>
import functools

import jax
import jax.numpy as jnp
from jax.experimental import pallas as pl
from jax.experimental.pallas import tpu as pltpu


def _round_up(n, m):
    return ((n + m - 1) // m) * m


def _sublane(dtype):
    # bf16 packs 2 rows per (8,128) sublane tile -> 16-row granularity.
    return 16 if jnp.dtype(dtype).itemsize == 2 else 8


def _fused_mlp_kernel(*refs, num_layers, matmul_dtype):
    """o = sigmoid(relu(...relu(x@W0+b0)...)@W_{L-1}+b_{L-1}).

    refs = (x_ref, w0, b0, ..., w_{L-1}, b_{L-1}, o_ref)
      x_ref: (TB, K0) matmul_dtype   w_l: (K_l, N_l) matmul_dtype
      b_l:   (1, N_l) f32            o_ref: (TB, N_last) f32
    Padded weight rows/cols and bias lanes are zero, so padded activation
    lanes stay exactly 0 through the ReLU chain (padded sigmoid lanes are
    discarded by the wrapper slice).
    """
    x_ref = refs[0]
    o_ref = refs[-1]
    wb_refs = refs[1:-1]

    act = x_ref[...]  # already in matmul_dtype (cast hoisted to the host pad)
    for l in range(num_layers):
        w = wb_refs[2 * l][...]
        b = wb_refs[2 * l + 1][...]          # (1, N) f32, broadcasts over rows
        y = jnp.dot(act, w, preferred_element_type=jnp.float32) + b
        if l < num_layers - 1:
            act = jnp.maximum(y, 0.0).astype(matmul_dtype)       # ReLU (hidden)
        else:
            o_ref[...] = jax.nn.sigmoid(y).astype(o_ref.dtype)   # f32 epilogue


def prepare_net(params, matmul_dtype=jnp.bfloat16):
    """One-time host-side preparation: pad/cast weights & biases to 128 lanes.

    params: list of (w, b) with w: (in_features, out_features), b: (out_features,)
    Returns a dict consumed by net_forward; call this once, reuse per forward.
    """
    dims = [params[0][0].shape[0]] + [w.shape[1] for (w, _) in params]
    pdims = [_round_up(d, 128) for d in dims]

    flat_wb = []
    wb_bytes = 0
    for l, (w, b) in enumerate(params):
        kp, np_ = pdims[l], pdims[l + 1]
        w_p = (jnp.zeros((kp, np_), matmul_dtype)
               .at[: w.shape[0], : w.shape[1]].set(w.astype(matmul_dtype)))
        b_p = (jnp.zeros((1, np_), jnp.float32)
               .at[0, : b.shape[0]].set(b.astype(jnp.float32)))
        flat_wb += [w_p, b_p]
        wb_bytes += w_p.size * jnp.dtype(matmul_dtype).itemsize + np_ * 4

    return {
        "flat_wb": tuple(flat_wb),
        "dims": tuple(dims),
        "pdims": tuple(pdims),
        "num_layers": len(params),
        "matmul_dtype": matmul_dtype,
        "wb_bytes": int(wb_bytes),
    }


def net_forward(x, prepared, *, batch_tile=512, min_batch_tiles=2):
    """Forward pass of `Net` as a single fused Pallas kernel.

    x:        (batch, in_features) float32
    prepared: output of prepare_net(params, matmul_dtype)
    """
    batch = x.shape[0]
    matmul_dtype = prepared["matmul_dtype"]
    dims, pdims = prepared["dims"], prepared["pdims"]
    num_layers = prepared["num_layers"]
    out_features = dims[-1]

    # --- batch tiling: tile-count-first, sublane-aligned, >=2 tiles for v7x ---
    sublane = _sublane(matmul_dtype)
    if batch >= sublane:
        n_tiles = max(pl.cdiv(batch, batch_tile), min_batch_tiles)
        n_tiles = max(1, min(n_tiles, batch // sublane))
    else:
        n_tiles = 1
    tb = _round_up(pl.cdiv(batch, n_tiles), sublane)
    pbatch = _round_up(batch, tb)

    # Per-call input padding + cast to the matmul dtype (halves x DMA for bf16).
    x_p = (jnp.zeros((pbatch, pdims[0]), matmul_dtype)
           .at[:batch, : dims[0]].set(x.astype(matmul_dtype)))

    # Streamed input tile: default double-buffered. Weights/biases: constant
    # index_map + single buffer (fetched once, resident across batch tiles).
    in_specs = [pl.BlockSpec((tb, pdims[0]), lambda i: (i, 0))]
    for l in range(num_layers):
        kp, np_ = pdims[l], pdims[l + 1]
        in_specs += [
            pl.BlockSpec((kp, np_), lambda i: (0, 0), pipeline_mode=pl.Buffered(1)),
            pl.BlockSpec((1, np_), lambda i: (0, 0), pipeline_mode=pl.Buffered(1)),
        ]

    # Explicit VMEM budget: resident weights (1 buffer) + double-buffered
    # x/out tiles + headroom; clamp to the v7x 64 MiB physical ceiling.
    # TODO(synk): add a K/N-tiled fallback (reduction grid axis + pl.when
    # accumulator) once the padded weight set exceeds ~24 MiB on v7x.
    itemsize = jnp.dtype(matmul_dtype).itemsize
    x_tile_bytes = tb * pdims[0] * itemsize
    o_tile_bytes = tb * pdims[-1] * 4
    vmem_bytes = int(prepared["wb_bytes"] + 2 * (x_tile_bytes + o_tile_bytes)
                     + (16 << 20))
    vmem_bytes = min(vmem_bytes, 64 << 20)

    kernel = functools.partial(
        _fused_mlp_kernel, num_layers=num_layers, matmul_dtype=matmul_dtype
    )
    out_p = pl.pallas_call(
        kernel,
        out_shape=jax.ShapeDtypeStruct((pbatch, pdims[-1]), jnp.float32),
        grid=(pbatch // tb,),
        in_specs=in_specs,
        out_specs=pl.BlockSpec((tb, pdims[-1]), lambda i: (i, 0)),
        compiler_params=pltpu.CompilerParams(
            dimension_semantics=("parallel",),   # batch tiles shard across TCs (v7x)
            vmem_limit_bytes=vmem_bytes,
        ),
    )(x_p, *prepared["flat_wb"])

    # Slice away batch padding and padded output lanes.
    return out_p[:batch, :out_features]


def init_params(layers, key):
    """Deterministic init matching nn.Linear's U(-1/sqrt(fan_in), 1/sqrt(fan_in)).

    Weights are stored as (in_features, out_features) so the kernel computes x @ W.
    """
    params = []
    for in_size, out_size in zip(layers, layers[1:]):
        key, wk, bk = jax.random.split(key, 3)
        bound = 1.0 / jnp.sqrt(in_size)
        w = jax.random.uniform(wk, (in_size, out_size), jnp.float32, -bound, bound)
        b = jax.random.uniform(bk, (out_size,), jnp.float32, -bound, bound)
        params.append((w, b))
    return params


def net_forward_ref(x, params):
    """Plain-JAX f32 reference for validation."""
    num_layers = len(params)
    act = x
    for l, (w, b) in enumerate(params):
        y = act @ w + b
        act = jnp.maximum(y, 0.0) if l < num_layers - 1 else jax.nn.sigmoid(y)
    return act


if __name__ == "__main__":
    # Layers = [32, 64, 48, 16] -> 3 Linear layers (2 ReLU hidden + 1 Sigmoid out)
    layers = [32, 64, 48, 16]
    batch = 8

    key = jax.random.PRNGKey(0)
    key, xk = jax.random.split(key)
    x = jax.random.normal(xk, (batch, layers[0]), jnp.float32)
    params = init_params(layers, key)

    ref = net_forward_ref(x, params)

    # Full-precision path (f32 matmul inputs): tight check vs f32 reference.
    prep_f32 = prepare_net(params, matmul_dtype=jnp.float32)
    out_f32 = jax.block_until_ready(net_forward(x, prep_f32))
    assert out_f32.shape == (batch, layers[-1])
    assert jnp.allclose(out_f32, ref, atol=1e-5, rtol=1e-5)

    # bf16-matmul path (MXU-native, f32 accumulation + f32 epilogue): looser
    # tolerance vs the f32 reference (sigmoid output is in (0, 1)).
    prep_bf16 = prepare_net(params, matmul_dtype=jnp.bfloat16)
    out_bf16 = jax.block_until_ready(net_forward(x, prep_bf16))
    assert out_bf16.shape == (batch, layers[-1])
    assert jnp.allclose(out_bf16, ref, atol=2e-2, rtol=2e-2)

    print("KERNEL_OK")
</pallas_src>

<mosaic_0001>
module attributes {stable_mosaic.version = 11 : i64} {
  func.func @_fused_mlp_kernel(%arg0: i32, %arg1: memref<8x128xf32, #tpu.memory_space<vmem>>, %arg2: memref<128x128xf32, #tpu.memory_space<vmem>>, %arg3: memref<1x128xf32, #tpu.memory_space<vmem>>, %arg4: memref<128x128xf32, #tpu.memory_space<vmem>>, %arg5: memref<1x128xf32, #tpu.memory_space<vmem>>, %arg6: memref<128x128xf32, #tpu.memory_space<vmem>>, %arg7: memref<1x128xf32, #tpu.memory_space<vmem>>, %arg8: memref<8x128xf32, #tpu.memory_space<vmem>>) attributes {dimension_semantics = [#tpu.dimension_semantics<parallel>], iteration_bounds = array<i64: 1>, scalar_prefetch = 0 : i64, scratch_operands = 0 : i64, tpu.core_type = #tpu.core_type<tc>, window_params = [{transform_indices = @transform_0, window_bounds = array<i64: 8, 128>}, {pipeline_mode = #tpu.pipeline_mode<synchronous>, transform_indices = @transform_1, window_bounds = array<i64: 128, 128>}, {pipeline_mode = #tpu.pipeline_mode<synchronous>, transform_indices = @transform_2, window_bounds = array<i64: 1, 128>}, {pipeline_mode = #tpu.pipeline_mode<synchronous>, transform_indices = @transform_3, window_bounds = array<i64: 128, 128>}, {pipeline_mode = #tpu.pipeline_mode<synchronous>, transform_indices = @transform_4, window_bounds = array<i64: 1, 128>}, {pipeline_mode = #tpu.pipeline_mode<synchronous>, transform_indices = @transform_5, window_bounds = array<i64: 128, 128>}, {pipeline_mode = #tpu.pipeline_mode<synchronous>, transform_indices = @transform_6, window_bounds = array<i64: 1, 128>}, {transform_indices = @transform_7, window_bounds = array<i64: 8, 128>}]} {
    %c0 = arith.constant 0 : index
    %c0_0 = arith.constant 0 : index
    %0 = vector.load %arg1[%c0, %c0_0] : memref<8x128xf32, #tpu.memory_space<vmem>>, vector<8x128xf32>
    %c0_1 = arith.constant 0 : index
    %c0_2 = arith.constant 0 : index
    %1 = vector.load %arg2[%c0_1, %c0_2] : memref<128x128xf32, #tpu.memory_space<vmem>>, vector<128x128xf32>
    %c0_3 = arith.constant 0 : index
    %c0_4 = arith.constant 0 : index
    %2 = vector.load %arg3[%c0_3, %c0_4] : memref<1x128xf32, #tpu.memory_space<vmem>>, vector<1x128xf32>
    %cst = arith.constant dense<0.000000e+00> : vector<8x128xf32>
    %3 = tpu.matmul %0, %1, %cst {dimension_numbers = #tpu.dot_dimension_numbers<[1], [0], [0], [1], [0, 0, 1, 1], [], []>} : vector<8x128xf32>, vector<128x128xf32>, vector<8x128xf32> -> vector<8x128xf32>
    %4 = vector.broadcast %2 : vector<1x128xf32> to vector<8x128xf32>
    %5 = arith.addf %3, %4 : vector<8x128xf32>
    %cst_5 = arith.constant 0.000000e+00 : f32
    %6 = vector.broadcast %cst_5 : f32 to vector<8x128xf32>
    %7 = arith.maximumf %5, %6 : vector<8x128xf32>
    %c0_6 = arith.constant 0 : index
    %c0_7 = arith.constant 0 : index
    %8 = vector.load %arg4[%c0_6, %c0_7] : memref<128x128xf32, #tpu.memory_space<vmem>>, vector<128x128xf32>
    %c0_8 = arith.constant 0 : index
    %c0_9 = arith.constant 0 : index
    %9 = vector.load %arg5[%c0_8, %c0_9] : memref<1x128xf32, #tpu.memory_space<vmem>>, vector<1x128xf32>
    %cst_10 = arith.constant dense<0.000000e+00> : vector<8x128xf32>
    %10 = tpu.matmul %7, %8, %cst_10 {dimension_numbers = #tpu.dot_dimension_numbers<[1], [0], [0], [1], [0, 0, 1, 1], [], []>} : vector<8x128xf32>, vector<128x128xf32>, vector<8x128xf32> -> vector<8x128xf32>
    %11 = vector.broadcast %9 : vector<1x128xf32> to vector<8x128xf32>
    %12 = arith.addf %10, %11 : vector<8x128xf32>
    %cst_11 = arith.constant 0.000000e+00 : f32
    %13 = vector.broadcast %cst_11 : f32 to vector<8x128xf32>
    %14 = arith.maximumf %12, %13 : vector<8x128xf32>
    %c0_12 = arith.constant 0 : index
    %c0_13 = arith.constant 0 : index
    %15 = vector.load %arg6[%c0_12, %c0_13] : memref<128x128xf32, #tpu.memory_space<vmem>>, vector<128x128xf32>
    %c0_14 = arith.constant 0 : index
    %c0_15 = arith.constant 0 : index
    %16 = vector.load %arg7[%c0_14, %c0_15] : memref<1x128xf32, #tpu.memory_space<vmem>>, vector<1x128xf32>
    %cst_16 = arith.constant dense<0.000000e+00> : vector<8x128xf32>
    %17 = tpu.matmul %14, %15, %cst_16 {dimension_numbers = #tpu.dot_dimension_numbers<[1], [0], [0], [1], [0, 0, 1, 1], [], []>} : vector<8x128xf32>, vector<128x128xf32>, vector<8x128xf32> -> vector<8x128xf32>
    %18 = vector.broadcast %16 : vector<1x128xf32> to vector<8x128xf32>
    %19 = arith.addf %17, %18 : vector<8x128xf32>
    %20 = arith.negf %19 : vector<8x128xf32>
    %21 = math.exp %20 : vector<8x128xf32>
    %cst_17 = arith.constant 1.000000e+00 : f32
    %22 = vector.broadcast %cst_17 : f32 to vector<8x128xf32>
    %23 = arith.addf %22, %21 : vector<8x128xf32>
    %24 = arith.divf %22, %23 : vector<8x128xf32>
    %c0_18 = arith.constant 0 : index
    %c0_19 = arith.constant 0 : index
    %25 = vector.load %arg8[%c0_18, %c0_19] : memref<8x128xf32, #tpu.memory_space<vmem>>, vector<8x128xf32>
    tpu.vector_store %arg8[%c0_18, %c0_19], %24 {strides = array<i32>} : memref<8x128xf32, #tpu.memory_space<vmem>>, vector<8x128xf32>,
    return
  }
  func.func @transform_0(%arg0: i32) -> (i32, i32) {
    %c0_i32 = arith.constant 0 : i32
    %c0_i32_0 = arith.constant 0 : i32
    return %arg0, %c0_i32 : i32, i32
  }
  func.func @transform_1(%arg0: i32) -> (i32, i32) {
    %c0_i32 = arith.constant 0 : i32
    %c0_i32_0 = arith.constant 0 : i32
    %c0_i32_1 = arith.constant 0 : i32
    return %c0_i32, %c0_i32_0 : i32, i32
  }
  func.func @transform_2(%arg0: i32) -> (i32, i32) {
    %c0_i32 = arith.constant 0 : i32
    %c0_i32_0 = arith.constant 0 : i32
    %c0_i32_1 = arith.constant 0 : i32
    return %c0_i32, %c0_i32_0 : i32, i32
  }
  func.func @transform_3(%arg0: i32) -> (i32, i32) {
    %c0_i32 = arith.constant 0 : i32
    %c0_i32_0 = arith.constant 0 : i32
    %c0_i32_1 = arith.constant 0 : i32
    return %c0_i32, %c0_i32_0 : i32, i32
  }
  func.func @transform_4(%arg0: i32) -> (i32, i32) {
    %c0_i32 = arith.constant 0 : i32
    %c0_i32_0 = arith.constant 0 : i32
    %c0_i32_1 = arith.constant 0 : i32
    return %c0_i32, %c0_i32_0 : i32, i32
  }
  func.func @transform_5(%arg0: i32) -> (i32, i32) {
    %c0_i32 = arith.constant 0 : i32
    %c0_i32_0 = arith.constant 0 : i32
    %c0_i32_1 = arith.constant 0 : i32
    return %c0_i32, %c0_i32_0 : i32, i32
  }
  func.func @transform_6(%arg0: i32) -> (i32, i32) {
    %c0_i32 = arith.constant 0 : i32
    %c0_i32_0 = arith.constant 0 : i32
    %c0_i32_1 = arith.constant 0 : i32
    return %c0_i32, %c0_i32_0 : i32, i32
  }
  func.func @transform_7(%arg0: i32) -> (i32, i32) {
    %c0_i32 = arith.constant 0 : i32
    %c0_i32_0 = arith.constant 0 : i32
    return %arg0, %c0_i32 : i32, i32
  }
}

</mosaic_0001>

<bundles_post_ra>
// kernel: tpu_custom_call.1
= control target key start
LH: loop header
LB: loop body
LE: loop exit
PB: predicated region body
PF: predicated region fallthrough
CT: control target
= control target key end

     0   :  { %12 = vsyncpa [#allocation3], 0  ;;  %s908_s0 = inlined_call_operand.hbm [shape: f32[8,128], index: 0, kind: input, shape index: {}]   ;;  %s909_s1 = inlined_call_operand.hbm [shape: f32[128,128], index: 1, kind: input, shape index: {}]   ;;  %s910_s2 = inlined_call_operand.vmem [shape: f32[1,128], index: 2, kind: input, shape index: {}]   ;;  %s911_s3 = inlined_call_operand.hbm [shape: f32[128,128], index: 3, kind: input, shape index: {}]   ;;  %s912_s4 = inlined_call_operand.vmem [shape: f32[1,128], index: 4, kind: input, shape index: {}]   ;;  %s913_s5 = inlined_call_operand.hbm [shape: f32[128,128], index: 5, kind: input, shape index: {}]   ;;  %s914_s6 = inlined_call_operand.vmem [shape: f32[1,128], index: 6, kind: input, shape index: {}]   ;;  %s915_s7 = inlined_call_operand.hbm [shape: f32[8,128], index: 7, kind: output, shape index: {}]  }
   0x1   :  { %13 = vsyncpa [#allocation6], 0 }
   0x2   :  { %14 = vsyncpa [#allocation9], 0 }
   0x3   :  { %15 = vsyncpa [#allocation4], 0  ;;  %s750_s24 = smov [#allocation5]   ;;  %s632_s28 = scalar_lea.hbm %s909_s1, 2048 }
   0x4   :  { %s31_s25 = sshll.u32 %s750_s24, 4  ;;  %p633_p0 = scmp.ne.s32.totalorder %s909_s1, %s632_s28  ;;  %s32_s25 = int_to_ptr.vmem [resolvable:$true] %s31_s25 }
   0x5   :  { %p636_p1 = scmp.lt.u32.totalorder %s632_s28, %s909_s1 }
   0x7   :  { %p638_p2 = pnand %p636_p1, %p633_p0 }
   0x9   :  { %641 = shalt.err (!%p638_p2)
}
   0xa   :  { %s642_s10 = scalar_lea.vmem %s32_s25, 2048  ;;  %p647_p4 = scmp.lt.s32.totalorder %s32_s25, %s32_s25 }
   0xb   :  { %p643_p3 = scmp.ne.s32.totalorder %s32_s25, %s642_s10  ;;  %p648_p5 = scmp.lt.s32.totalorder %s642_s10, %s642_s10 }
   0xd   :  { %p649_p6 = por %p648_p5, %p647_p4 }
   0xf   :  { %p650_p7 = pnand %p649_p6, %p643_p3 }
  0x11   :  { %653 = shalt.err (!%p650_p7)
}
  0x12   :  { %s751_s11 = smov 128   ;;  %s752_s12 = smov 8  }
  0x13   :  { %37 = dma.hbm_to_vmem [thread:$0]  %s909_s1, 2048, %s32_s25, [#allocation6], %s751_s11, %s751_s11, %s752_s12  }
  0x14   :  { %s753_s15 = smov [#allocation2]   ;;  %s754_s17 = smov [#allocation7]  }
  0x15   :  { %s22_s16 = sshll.u32 %s753_s15, 4  ;;  %s45_s18 = sshll.u32 %s754_s17, 4  ;;  %s23_s16 = int_to_ptr.vmem [resolvable:$true] %s22_s16  ;;  %s46_s18 = int_to_ptr.vmem [resolvable:$true] %s45_s18 }
  0x16   :  { %s654_s21 = scalar_lea.hbm %s908_s0, 128 }
  0x17   :  { %p655_p8 = scmp.ne.s32.totalorder %s908_s0, %s654_s21  ;;  %p658_p9 = scmp.lt.u32.totalorder %s654_s21, %s908_s0 }
  0x19   :  { %p660_p10 = pnand %p658_p9, %p655_p8 }
  0x1b   :  { %663 = shalt.err (!%p660_p10)
}
  0x1c   :  { %s664_s1 = scalar_lea.vmem %s23_s16, 128  ;;  %p669_p12 = scmp.lt.s32.totalorder %s23_s16, %s23_s16 }
  0x1d   :  { %p665_p11 = scmp.ne.s32.totalorder %s23_s16, %s664_s1  ;;  %p670_p13 = scmp.lt.s32.totalorder %s664_s1, %s664_s1 }
  0x1f   :  { %p671_p0 = por %p670_p13, %p669_p12 }
  0x21   :  { %p672_p1 = pnand %p671_p0, %p665_p11 }
  0x23   :  { %675 = shalt.err (!%p672_p1)
}
  0x24   :  { %25 = dma.hbm_to_vmem [thread:$0]  %s908_s0, 128, %s23_s16, [#allocation3]  }
  0x25   :  { %s676_s30 = scalar_lea.hbm %s911_s3, 2048 }
  0x26   :  { %p677_p2 = scmp.ne.s32.totalorder %s911_s3, %s676_s30  ;;  %p680_p3 = scmp.lt.u32.totalorder %s676_s30, %s911_s3 }
  0x28   :  { %p682_p4 = pnand %p680_p3, %p677_p2 }
  0x2a   :  { %685 = shalt.err (!%p682_p4)
}
  0x2b   :  { %s686_s14 = scalar_lea.vmem %s46_s18, 2048  ;;  %p691_p6 = scmp.lt.s32.totalorder %s46_s18, %s46_s18 }
  0x2c   :  { %p687_p5 = scmp.ne.s32.totalorder %s46_s18, %s686_s14  ;;  %p692_p7 = scmp.lt.s32.totalorder %s686_s14, %s686_s14 }
  0x2e   :  { %p693_p8 = por %p692_p7, %p691_p6 }
  0x30   :  { %p694_p9 = pnand %p693_p8, %p687_p5 }
  0x32   :  { %697 = shalt.err (!%p694_p9)
}
  0x33   :  { %51 = dma.hbm_to_vmem [thread:$0]  %s911_s3, 2048, %s46_s18, [#allocation6], %s751_s11, %s751_s11, %s752_s12  }
  0x34   :  { %s755_s16 = smov [#allocation8]   ;;  %s698_s21 = scalar_lea.hbm %s913_s5, 2048 }
  0x35   :  { %s59_s17 = sshll.u32 %s755_s16, 4  ;;  %p699_p10 = scmp.ne.s32.totalorder %s913_s5, %s698_s21  ;;  %s60_s17 = int_to_ptr.vmem [resolvable:$true] %s59_s17 }
  0x36   :  { %p702_p11 = scmp.lt.u32.totalorder %s698_s21, %s913_s5 }
  0x38   :  { %p704_p12 = pnand %p702_p11, %p699_p10 }
  0x3a   :  { %707 = shalt.err (!%p704_p12)
}
  0x3b   :  { %s708_s1 = scalar_lea.vmem %s60_s17, 2048  ;;  %p713_p0 = scmp.lt.s32.totalorder %s60_s17, %s60_s17 }
  0x3c   :  { %p709_p13 = scmp.ne.s32.totalorder %s60_s17, %s708_s1  ;;  %p714_p1 = scmp.lt.s32.totalorder %s708_s1, %s708_s1 }
  0x3e   :  { %p715_p2 = por %p714_p1, %p713_p0 }
  0x40   :  { %p716_p3 = pnand %p715_p2, %p709_p13 }
  0x42   :  { %719 = shalt.err (!%p716_p3)
}
  0x43   :  { %65 = dma.hbm_to_vmem [thread:$0]  %s913_s5, 2048, %s60_s17, [#allocation9], %s751_s11, %s751_s11, %s752_s12  }
  0x44   :  { %742 = dma.done.wait [#allocation3], 128  }
  0x45   :  { %743 = vsyncadd [#allocation3], 4294967168 }
  0x46   :  { %744 = dma.done.wait [#allocation6], 4096  }
  0x47   :  { %745 = vsyncadd [#allocation6], 4294963200 }
  0x48   :  { %746 = dma.done.wait [#allocation9], 2048  }
  0x49   :  { %747 = vsyncadd [#allocation9], 4294965248  ;;  %v756_v0 = vmov 0.0|0.0   ;;  %vm757_vm0 = vmmov 0   ;;  %v758_v1 = vmov 0.0   ;;  %v81_v2 = vld [vmem:[#allocation5] sm:$0xff] }
  0x4a   :  { %546 = vmatprep.subr.bf16.mxu0 %v756_v0  ;;  %473 = vmatprep.mubr.msk.f32.mxu0 %vm757_vm0, %v758_v1  ;;  %v82_v3 = vld [vmem:[#allocation5 + $0x8] sm:$0xff]  ;;  %v83_v4 = vld [vmem:[#allocation5 + $0x10] sm:$0xff]  ;;  %v84_v6 = vld [vmem:[#allocation5 + $0x18] sm:$0xff]  ;;  %s759_s28 = smov [#allocation10]  }
  0x4b   :  { %570 = vmatprep.subr.bf16.mxu1 %v756_v0  ;;  %508 = vmatprep.mubr.msk.f32.mxu1 %vm757_vm0, %v758_v1  ;;  %v547_v5 = vpack.c.bf16 %v82_v3, %v81_v2  ;;  %v550_v7 = vpack.c.bf16 %v84_v6, %v83_v4  ;;  %v85_v8 = vld [vmem:[#allocation5 + $0x20] sm:$0xff]  ;;  %v86_v9 = vld [vmem:[#allocation5 + $0x28] sm:$0xff]  ;;  %v177_v12 = vld [vmem:[#allocation7 + $0x10] sm:$0xff]  ;;  %s375_s29 = sshll.u32 %s759_s28, 4  ;;  %s376_s29 = int_to_ptr.vmem [resolvable:$true] %s375_s29 }
  0x4c   :  { %v175_v10 = vld [vmem:[#allocation7] sm:$0xff]  ;;  %v176_v11 = vld [vmem:[#allocation7 + $0x8] sm:$0xff]  ;;  %v178_v13 = vld [vmem:[#allocation7 + $0x18] sm:$0xff]  ;;  %v553_v14 = vpack.c.bf16 %v86_v9, %v85_v8  ;;  %p725_p5 = scmp.lt.s32.totalorder %s376_s29, %s376_s29 }
  0x4d   :  { %548 = vmatpush3.bf16.msra.mxu0 %v547_v5  ;;  %v571_v15 = vpack.c.bf16 %v176_v11, %v175_v10  ;;  %v87_v16 = vld [vmem:[#allocation5 + $0x30] sm:$0xff]  ;;  %v88_v17 = vld [vmem:[#allocation5 + $0x38] sm:$0xff]  ;;  %v574_v18 = vpack.c.bf16 %v178_v13, %v177_v12  ;;  %v179_v19 = vld [vmem:[#allocation7 + $0x20] sm:$0xff] }
  0x4e   :  { %549 = vmatprep.subr.bf16.mxu0 %v756_v0  ;;  %v180_v20 = vld [vmem:[#allocation7 + $0x28] sm:$0xff]  ;;  %v556_v21 = vpack.c.bf16 %v88_v17, %v87_v16  ;;  %v89_v22 = vld [vmem:[#allocation5 + $0x40] sm:$0xff]  ;;  %v181_v25 = vld [vmem:[#allocation7 + $0x30] sm:$0xff] }
  0x4f   :  { %572 = vmatpush3.bf16.msra.mxu1 %v571_v15  ;;  %v90_v23 = vld [vmem:[#allocation5 + $0x48] sm:$0xff]  ;;  %v577_v24 = vpack.c.bf16 %v180_v20, %v179_v19  ;;  %v182_v26 = vld [vmem:[#allocation7 + $0x38] sm:$0xff]  ;;  %v91_v28 = vld [vmem:[#allocation5 + $0x50] sm:$0xff] }
  0x50   :  { %573 = vmatprep.subr.bf16.mxu1 %v756_v0  ;;  %v559_v27 = vpack.c.bf16 %v90_v23, %v89_v22  ;;  %v92_v29 = vld [vmem:[#allocation5 + $0x58] sm:$0xff]  ;;  %v580_v30 = vpack.c.bf16 %v182_v26, %v181_v25  ;;  %v183_v31 = vld [vmem:[#allocation7 + $0x40] sm:$0xff]  ;;  %v184_v32 = vld [vmem:[#allocation7 + $0x48] sm:$0xff] }
  0x51   :  { %551 = vmatpush3.bf16.msra.mxu0 %v550_v7  ;;  %v562_v33 = vpack.c.bf16 %v92_v29, %v91_v28  ;;  %v93_v34 = vld [vmem:[#allocation5 + $0x60] sm:$0xff]  ;;  %v94_v35 = vld [vmem:[#allocation5 + $0x68] sm:$0xff]  ;;  %v583_v36 = vpack.c.bf16 %v184_v32, %v183_v31  ;;  %v185_v37 = vld [vmem:[#allocation7 + $0x50] sm:$0xff] }
  0x52   :  { %552 = vmatprep.subr.bf16.mxu0 %v756_v0  ;;  %v186_v38 = vld [vmem:[#allocation7 + $0x58] sm:$0xff]  ;;  %v565_v39 = vpack.c.bf16 %v94_v35, %v93_v34  ;;  %v95_v40 = vld [vmem:[#allocation5 + $0x70] sm:$0xff]  ;;  %v187_v43 = vld [vmem:[#allocation7 + $0x60] sm:$0xff] }
  0x53   :  { %575 = vmatpush3.bf16.msra.mxu1 %v574_v18  ;;  %v96_v41 = vld [vmem:[#allocation5 + $0x78] sm:$0xff]  ;;  %v586_v42 = vpack.c.bf16 %v186_v38, %v185_v37  ;;  %v188_v44 = vld [vmem:[#allocation7 + $0x68] sm:$0xff]  ;;  %v189_v48 = vld [vmem:[#allocation7 + $0x70] sm:$0xff] }
  0x54   :  { %576 = vmatprep.subr.bf16.mxu1 %v756_v0  ;;  %v568_v45 = vpack.c.bf16 %v96_v41, %v95_v40  ;;  %v589_v46 = vpack.c.bf16 %v188_v44, %v187_v43  ;;  %v80_v47 = vld [vmem:[#allocation2] sm:$0xff]  ;;  %v269_v51 = vld [vmem:[#allocation8] sm:$0xff]  ;;  %v270_v52 = vld [vmem:[#allocation8 + $0x8] sm:$0xff] }
  0x55   :  { %554 = vmatpush3.bf16.msra.mxu0 %v553_v14  ;;  %v190_v49 = vld [vmem:[#allocation7 + $0x78] sm:$0xff]  ;;  %v271_v53 = vld [vmem:[#allocation8 + $0x10] sm:$0xff]  ;;  %v595_v54 = vpack.c.bf16 %v270_v52, %v269_v51  ;;  %v273_v57 = vld [vmem:[#allocation8 + $0x20] sm:$0xff] }
  0x56   :  { %555 = vmatprep.subr.bf16.mxu0 %v756_v0  ;;  %v592_v50 = vpack.c.bf16 %v190_v49, %v189_v48  ;;  %v272_v55 = vld [vmem:[#allocation8 + $0x18] sm:$0xff]  ;;  %v274_v58 = vld [vmem:[#allocation8 + $0x28] sm:$0xff]  ;;  %v275_v60 = vld [vmem:[#allocation8 + $0x30] sm:$0xff] }
  0x57   :  { %578 = vmatpush3.bf16.msra.mxu1 %v577_v24  ;;  %v598_v56 = vpack.c.bf16 %v272_v55, %v271_v53  ;;  %v601_v59 = vpack.c.bf16 %v274_v58, %v273_v57  ;;  %v276_v61 = vld [vmem:[#allocation8 + $0x38] sm:$0xff]  ;;  %v277_v63 = vld [vmem:[#allocation8 + $0x40] sm:$0xff]  ;;  %v279_v3 = vld [vmem:[#allocation8 + $0x50] sm:$0xff] }
  0x58   :  { %579 = vmatprep.subr.bf16.mxu1 %v756_v0  ;;  %v604_v62 = vpack.c.bf16 %v276_v61, %v275_v60  ;;  %v280_v4 = vld [vmem:[#allocation8 + $0x58] sm:$0xff]  ;;  %v281_v6 = vld [vmem:[#allocation8 + $0x60] sm:$0xff]  ;;  %v282_v7 = vld [vmem:[#allocation8 + $0x68] sm:$0xff] }
  0x59   :  { %557 = vmatpush3.bf16.msra.mxu0 %v556_v21  ;;  %v610_v5 = vpack.c.bf16 %v280_v4, %v279_v3  ;;  %v613_v8 = vpack.c.bf16 %v282_v7, %v281_v6  ;;  %v386_v9 = vld [vmem:[%s910_s2] ss:$0 sm:$0xff]  ;;  %v283_v14 = vld [vmem:[#allocation8 + $0x70] sm:$0xff] }
  0x5a   :  { %558 = vmatprep.subr.bf16.mxu0 %v756_v0  ;;  %v284_v15 = vld [vmem:[#allocation8 + $0x78] sm:$0xff] }
  0x5b   :  { %581 = vmatpush3.bf16.msra.mxu1 %v580_v30  ;;  %v616_v16 = vpack.c.bf16 %v284_v15, %v283_v14  ;;  %v387_v17 = vld [vmem:[%s912_s4] ss:$0 sm:$0xff]  ;;  %s720_s4 = scalar_lea.vmem %s376_s29, 128 }
  0x5c   :  { %582 = vmatprep.subr.bf16.mxu1 %v756_v0  ;;  %v388_v21 = vld [vmem:[%s914_s6] ss:$0 sm:$0xff]  ;;  %p721_p4 = scmp.ne.s32.totalorder %s376_s29, %s720_s4  ;;  %p726_p6 = scmp.lt.s32.totalorder %s720_s4, %s720_s4 }
  0x5d   :  { %560 = vmatpush3.bf16.msra.mxu0 %v559_v27 }
  0x5e   :  { %561 = vmatprep.subr.bf16.mxu0 %v756_v0  ;;  %p727_p7 = por %p726_p6, %p725_p5 }
  0x5f   :  { %584 = vmatpush3.bf16.msra.mxu1 %v583_v36 }
  0x60   :  { %585 = vmatprep.subr.bf16.mxu1 %v756_v0  ;;  %p728_p8 = pnand %p727_p7, %p721_p4 }
  0x61   :  { %563 = vmatpush3.bf16.msra.mxu0 %v562_v33 }
  0x62   :  { %564 = vmatprep.subr.bf16.mxu0 %v756_v0 }
  0x63   :  { %587 = vmatpush3.bf16.msra.mxu1 %v586_v42 }
  0x64   :  { %588 = vmatprep.subr.bf16.mxu1 %v756_v0 }
  0x65   :  { %566 = vmatpush3.bf16.msra.mxu0 %v565_v39 }
  0x66   :  { %567 = vmatprep.subr.bf16.mxu0 %v756_v0 }
  0x67   :  { %590 = vmatpush3.bf16.msra.mxu1 %v589_v46 }
  0x68   :  { %591 = vmatprep.subr.bf16.mxu1 %v756_v0 }
  0x69   :  { %569 = vmatpush3.bf16.msra.mxu0 %v568_v45 }
  0x6a   :  { %594 = vmatprep.subr.bf16.mxu0 %v756_v0 }
  0x6b   :  { %593 = vmatpush3.bf16.msra.mxu1 %v592_v50 }
  0x6c   :  { %474 = vmatmul.mubr.f32.vlgmr.msra.gmra.mrb[0].mxu0 %v80_v47 }
  0x6d   :  { %543 = vmatprep.mubr.msk.f32.mxu0 %vm757_vm0, %v758_v1  ;;  %596 = vmatpush3.bf16.msra.mxu0 %v595_v54  ;;  %v278_v1 = vld [vmem:[#allocation8 + $0x48] sm:$0xff] }
  0x6e   :  { %597 = vmatprep.subr.bf16.mxu0 %v756_v0  ;;  %v607_v2 = vpack.c.bf16 %v278_v1, %v277_v63 }
  0x71   :  { %599 = vmatpush3.bf16.msra.mxu0 %v598_v56 }
  0x72   :  { %600 = vmatprep.subr.bf16.mxu0 %v756_v0 }
  0x75   :  { %602 = vmatpush3.bf16.msra.mxu0 %v601_v59 }
  0x76   :  { %603 = vmatprep.subr.bf16.mxu0 %v756_v0 }
  0x79   :  { %605 = vmatpush3.bf16.msra.mxu0 %v604_v62 }
  0x7a   :  { %606 = vmatprep.subr.bf16.mxu0 %v756_v0 }
  0x7d   :  { %608 = vmatpush3.bf16.msra.mxu0 %v607_v2 }
  0x7e   :  { %609 = vmatprep.subr.bf16.mxu0 %v756_v0 }
  0x81   :  { %611 = vmatpush3.bf16.msra.mxu0 %v610_v5 }
  0x82   :  { %612 = vmatprep.subr.bf16.mxu0 %v756_v0 }
  0x85   :  { %614 = vmatpush3.bf16.msra.mxu0 %v613_v8 }
  0x86   :  { %615 = vmatprep.subr.bf16.mxu0 %v756_v0 }
  0x89   :  { %617 = vmatpush3.bf16.msra.mxu0 %v616_v16 }
 0x13f   :  { %v170_v10 = vpop.f32.mrb[0].mxu0 }
 0x140   :  { %v171_v11 = vadd.f32 %v386_v9, %v170_v10  ;;  %v475_v12 = vpop.f32.mrb[1].mxu0 }
 0x142   :  { %v174_v13 = vmax.f32 %v171_v11, 0.0 }
 0x144   :  { %509 = vmatmul.mubr.f32.vlgmr.msra.gmra.mrb[0].mxu1 %v174_v13 }
 0x217   :  { %v264_v18 = vpop.f32.mrb[0].mxu1 }
 0x218   :  { %v265_v19 = vadd.f32 %v387_v17, %v264_v18  ;;  %v510_v0 = vpop.f32.mrb[1].mxu1 }
 0x21a   :  { %v268_v20 = vmax.f32 %v265_v19, 0.0 }
 0x21c   :  { %544 = vmatmul.mubr.f32.vlgmr.msra.gmra.mrb[2].mxu0 %v268_v20 }
 0x2ef   :  { %v358_v22 = vpop.f32.mrb[2].mxu0 }
 0x2f0   :  { %v359_v23 = vadd.f32 %v388_v21, %v358_v22  ;;  %v545_v24 = vpop.f32.mrb[3].mxu0 }
 0x2f2   :  { %v389_v25 = vmul.f32 -1.442695, %v359_v23 }
 0x2f4   :  { %628 = vpow2.f32 %v389_v25 }
 0x2fe   :  { %v629_v26 = vpop.eup %628 }
 0x2ff   :  { %v365_v27 = vadd.f32 1.0, %v629_v26 }
 0x301   :  { %630 = vrcp.f32 %v365_v27 }
 0x30b   :  { %v631_v28 = vpop.eup %630 }
 0x30c   :  { %368 = vst [vmem:[#allocation10] sm:$0xff] %v631_v28 }
 0x30d   :  { %731 = shalt.err (!%p728_p8)
}
 0x30e   :  { %s732_s8 = scalar_lea.hbm %s915_s7, 128 }
 0x30f   :  { %p733_p9 = scmp.ne.s32.totalorder %s915_s7, %s732_s8  ;;  %p736_p10 = scmp.lt.u32.totalorder %s732_s8, %s915_s7 }
 0x311   :  { %p738_p11 = pnand %p736_p10, %p733_p9 }
 0x313   :  { %741 = shalt.err (!%p738_p11)
}
 0x314   :  { %378 = dma.vmem_to_hbm [thread:$0]  %s376_s29, 128, %s915_s7, [#allocation4]  }
 0x315   :  { %748 = dma.done.wait [#allocation4], 128  }
 0x316   :  { %749 = vsyncadd [#allocation4], 4294967168 }
 0x317   :  { %382 = vsyncpa [#allocation3], 1 }
 0x318   :  { %383 = vsyncpa [#allocation6], 1 }
 0x319   :  { %384 = vsyncpa [#allocation9], 1 }
 0x31a   :  { %385 = vsyncpa [#allocation4], 1 }

</bundles_post_ra>
